<compile_context>
chip_gen: v7x
topology: tpu7x:2x2x1
jax: 0.10.0
libtpu: 0.0.40
codegen_flags: <defaults>
</compile_context>

<pallas_src>
import jax
import jax.numpy as jnp
from jax.experimental import pallas as pl
from jax.experimental.pallas import tpu as pltpu

EPS = 1e-5
LANE = 128
NEG_BIG = -1e30  # finite "-inf" for masking padded lanes out of the softmax


def _round_up(x, m):
    return (x + m - 1) // m * m


# ----------------------------- fused kernel ---------------------------------

def _make_fused_mlp_kernel(num_hidden, out_dim, compute_dtype, write_emb):
    """Kernel refs: x, w_slab, gb_slab, w_last, b_last, out[, emb]."""

    def kernel(x_ref, w_ref, gb_ref, wl_ref, bl_ref, *out_refs):
        if write_emb:
            out_ref, emb_ref = out_refs
        else:
            (out_ref,) = out_refs

        h = x_ref[...]                                   # (n, D_pad), compute_dtype
        for l in range(num_hidden):
            # Linear (bias dropped: exactly cancelled by BN mean subtraction), MXU f32 acc.
            y = jnp.dot(h, w_ref[l, :, :], preferred_element_type=jnp.float32)
            # BatchNorm1d, biased batch statistics (torch training mode), all in f32.
            mean = jnp.mean(y, axis=0, keepdims=True)
            yc = y - mean                                # centered once, reused
            var = jnp.mean(yc * yc, axis=0, keepdims=True)
            gb = gb_ref[l, :, :]                         # (2, D_pad): gamma row 0, beta row 1
            scale = gb[0:1, :] * jax.lax.rsqrt(var + EPS)  # fold gamma into the scale
            beta = gb[1:2, :]
            # Padded feature columns are exactly 0 before and after this (zero weights,
            # zero beta), so BN stats and downstream matmuls are unaffected by padding.
            h = (yc * scale + beta).astype(compute_dtype)

        # Final layer: Linear (with bias) then log_softmax over the valid lanes only.
        emb = jnp.dot(h, wl_ref[...], preferred_element_type=jnp.float32) + bl_ref[...]
        if write_emb:
            emb_ref[...] = emb

        lane = jax.lax.broadcasted_iota(jnp.int32, emb.shape, 1)
        masked = jnp.where(lane < out_dim, emb, jnp.float32(NEG_BIG))
        m = jnp.max(masked, axis=1, keepdims=True)
        z = masked - m
        lse = jnp.log(jnp.sum(jnp.exp(z), axis=1, keepdims=True))
        out_ref[...] = (z - lse).astype(out_ref.dtype)

    return kernel


# ----------------------------- wrapper ---------------------------------------

def _full_spec(shape):
    # Whole-array block (full-extent blocks satisfy the (8,128) rule).
    return pl.BlockSpec(shape, lambda i: (0,) * len(shape))


def mlp_forward(x, packed, num_layers, dropout_rate=0.0, return_emb=True):
    """Single fused pallas_call for the whole MLP.

    dropout_rate is accepted but never applied (the reference forward applies no dropout).
    """
    w_slab, gb_slab, w_last, b_last, dims = packed
    input_dim, output_dim, d_pad, out_pad = dims
    compute_dtype = w_slab.dtype
    n = x.shape[0]
    num_hidden = num_layers - 1

    # Per-call pad+cast of the activations to the lane-dense compute layout (cheap XLA op).
    x_p = jnp.pad(x.astype(compute_dtype), ((0, 0), (0, d_pad - input_dim)))

    out_shapes = [jax.ShapeDtypeStruct((n, out_pad), jnp.float32)]
    out_specs = [_full_spec((n, out_pad))]
    if return_emb:
        out_shapes.append(jax.ShapeDtypeStruct((n, out_pad), jnp.float32))
        out_specs.append(_full_spec((n, out_pad)))

    results = pl.pallas_call(
        _make_fused_mlp_kernel(num_hidden, output_dim, compute_dtype, return_emb),
        out_shape=tuple(out_shapes),
        grid=(1,),
        in_specs=[
            _full_spec(x_p.shape),
            _full_spec(w_slab.shape),
            _full_spec(gb_slab.shape),
            _full_spec(w_last.shape),
            _full_spec(b_last.shape),
        ],
        out_specs=tuple(out_specs),
        compiler_params=pltpu.CompilerParams(
            dimension_semantics=("arbitrary",),
            vmem_limit_bytes=32 * 1024 * 1024,
        ),
    )(x_p, w_slab, gb_slab, w_last, b_last)

    res = {'out': results[0][:, :output_dim]}
    if return_emb:
        res['emb'] = results[1][:, :output_dim]
    return res


# ------------------------- parameter init (deterministic) --------------------

def init_params(key, num_layers, hidden_unit, input_dim, output_dim):
    """Torch-style parameters: W is (out, in), b is (out,); BN gamma=1, beta=0."""
    dims = [input_dim] + [hidden_unit] * (num_layers - 1) + [output_dim]
    lin_params = []
    for i in range(num_layers):
        key, kw, kb = jax.random.split(key, 3)
        bound = 1.0 / float(dims[i]) ** 0.5  # nn.Linear default init range
        w = jax.random.uniform(kw, (dims[i + 1], dims[i]),
                               minval=-bound, maxval=bound, dtype=jnp.float32)
        b = jax.random.uniform(kb, (dims[i + 1],),
                               minval=-bound, maxval=bound, dtype=jnp.float32)
        lin_params.append((w, b))
    # The module builds num_layers BN modules but only the first num_layers-1 are used.
    bn_params = [(jnp.ones((d,), jnp.float32), jnp.zeros((d,), jnp.float32)) for d in dims[1:]]
    return lin_params, bn_params


def pack_params(lin_params, bn_params, num_layers, compute_dtype=jnp.bfloat16):
    """One-time kernel-layout transform.

    Transposes weights to (in, out), zero-pads feature dims to 128-lane multiples,
    stacks all hidden-layer weights / (gamma, beta) into single slabs, casts matmul
    operands to compute_dtype (bf16 default, f32 accumulation in-kernel), and drops
    hidden-layer biases (cancelled exactly by BatchNorm's mean subtraction).
    """
    num_hidden = num_layers - 1
    input_dim = lin_params[0][0].shape[1]
    hidden_unit = lin_params[0][0].shape[0]
    output_dim = lin_params[-1][0].shape[0]

    d_pad = _round_up(max(input_dim, hidden_unit), LANE)
    out_pad = _round_up(output_dim, LANE)

    w_slab = jnp.zeros((num_hidden, d_pad, d_pad), compute_dtype)
    gb_slab = jnp.zeros((num_hidden, 2, d_pad), jnp.float32)
    for i in range(num_hidden):
        w, _b = lin_params[i]                     # pre-BN bias intentionally dropped
        g, be = bn_params[i]
        wt = w.T.astype(compute_dtype)            # (in, out)
        w_slab = w_slab.at[i, :wt.shape[0], :wt.shape[1]].set(wt)
        gb_slab = gb_slab.at[i, 0, :g.shape[0]].set(g)
        gb_slab = gb_slab.at[i, 1, :be.shape[0]].set(be)

    w_l, b_l = lin_params[num_layers - 1]
    w_last = jnp.zeros((d_pad, out_pad), compute_dtype)
    w_last = w_last.at[:w_l.shape[1], :w_l.shape[0]].set(w_l.T.astype(compute_dtype))
    b_last = jnp.zeros((1, out_pad), jnp.float32)
    b_last = b_last.at[0, :b_l.shape[0]].set(b_l)

    dims = (input_dim, output_dim, d_pad, out_pad)
    return w_slab, gb_slab, w_last, b_last, dims


# ------------------------------ reference (pure JAX) --------------------------

def mlp_forward_ref(x, lin_params, bn_params, num_layers):
    for i in range(num_layers - 1):
        w, b = lin_params[i]
        g, be = bn_params[i]
        y = x @ w.T + b
        mean = jnp.mean(y, axis=0, keepdims=True)
        var = jnp.mean((y - mean) ** 2, axis=0, keepdims=True)
        x = g * (y - mean) / jnp.sqrt(var + EPS) + be
    w, b = lin_params[num_layers - 1]
    emb = x @ w.T + b
    return {'out': jax.nn.log_softmax(emb, axis=1), 'emb': emb}


if __name__ == "__main__":
    num_layers = 3
    hidden_unit = 32
    input_dim = 16
    output_dim = 8
    dropout_rate = 0.1
    batch = 8

    key = jax.random.PRNGKey(0)
    kx, kp = jax.random.split(key)
    x = jax.random.normal(kx, (batch, input_dim), dtype=jnp.float32)
    lin_params, bn_params = init_params(kp, num_layers, hidden_unit, input_dim, output_dim)

    ref = mlp_forward_ref(x, lin_params, bn_params, num_layers)

    # f32 MXU path: tight check of the kernel math (padding, masking, BN, softmax).
    packed_f32 = pack_params(lin_params, bn_params, num_layers, compute_dtype=jnp.float32)
    res_f32 = mlp_forward(x, packed_f32, num_layers, dropout_rate)
    jax.block_until_ready(res_f32)
    assert res_f32['out'].shape == (batch, output_dim)
    assert res_f32['emb'].shape == (batch, output_dim)
    assert jnp.allclose(res_f32['emb'], ref['emb'], atol=1e-4, rtol=1e-4)
    assert jnp.allclose(res_f32['out'], ref['out'], atol=1e-4, rtol=1e-4)

    # bf16 MXU path (production default): bf16 operands, f32 accumulation -> looser tol.
    packed_bf16 = pack_params(lin_params, bn_params, num_layers)  # bf16 default
    res_bf16 = mlp_forward(x, packed_bf16, num_layers, dropout_rate)
    jax.block_until_ready(res_bf16)
    assert res_bf16['out'].shape == (batch, output_dim)
    assert res_bf16['emb'].shape == (batch, output_dim)
    assert jnp.allclose(res_bf16['emb'], ref['emb'], atol=5e-2, rtol=5e-2)
    assert jnp.allclose(res_bf16['out'], ref['out'], atol=5e-2, rtol=5e-2)

    print("KERNEL_OK")
</pallas_src>

<mosaic_0001>
module attributes {stable_mosaic.version = 11 : i64} {
  func.func @kernel(%arg0: i32, %arg1: memref<8x128xf32, #tpu.memory_space<vmem>>, %arg2: memref<2x128x128xf32, #tpu.memory_space<vmem>>, %arg3: memref<2x2x128xf32, #tpu.memory_space<vmem>>, %arg4: memref<128x128xf32, #tpu.memory_space<vmem>>, %arg5: memref<1x128xf32, #tpu.memory_space<vmem>>, %arg6: memref<8x128xf32, #tpu.memory_space<vmem>>, %arg7: memref<8x128xf32, #tpu.memory_space<vmem>>) attributes {dimension_semantics = [#tpu.dimension_semantics<arbitrary>], iteration_bounds = array<i64: 1>, scalar_prefetch = 0 : i64, scratch_operands = 0 : i64, tpu.core_type = #tpu.core_type<tc>, window_params = [{pipeline_mode = #tpu.pipeline_mode<synchronous>, transform_indices = @transform_0, window_bounds = array<i64: 8, 128>}, {pipeline_mode = #tpu.pipeline_mode<synchronous>, transform_indices = @transform_1, window_bounds = array<i64: 2, 128, 128>}, {pipeline_mode = #tpu.pipeline_mode<synchronous>, transform_indices = @transform_2, window_bounds = array<i64: 2, 2, 128>}, {pipeline_mode = #tpu.pipeline_mode<synchronous>, transform_indices = @transform_3, window_bounds = array<i64: 128, 128>}, {pipeline_mode = #tpu.pipeline_mode<synchronous>, transform_indices = @transform_4, window_bounds = array<i64: 1, 128>}, {pipeline_mode = #tpu.pipeline_mode<synchronous>, transform_indices = @transform_5, window_bounds = array<i64: 8, 128>}, {pipeline_mode = #tpu.pipeline_mode<synchronous>, transform_indices = @transform_6, window_bounds = array<i64: 8, 128>}]} {
    %c0 = arith.constant 0 : index
    %c0_0 = arith.constant 0 : index
    %0 = vector.load %arg1[%c0, %c0_0] : memref<8x128xf32, #tpu.memory_space<vmem>>, vector<8x128xf32>
    %c0_1 = arith.constant 0 : index
    %c0_2 = arith.constant 0 : index
    %c0_3 = arith.constant 0 : index
    %1 = vector.load %arg2[%c0_1, %c0_2, %c0_3] : memref<2x128x128xf32, #tpu.memory_space<vmem>>, vector<1x128x128xf32>
    %2 = vector.shape_cast %1 : vector<1x128x128xf32> to vector<128x128xf32>
    %cst = arith.constant dense<0.000000e+00> : vector<8x128xf32>
    %3 = tpu.matmul %0, %2, %cst {dimension_numbers = #tpu.dot_dimension_numbers<[1], [0], [0], [1], [0, 0, 1, 1], [], []>} : vector<8x128xf32>, vector<128x128xf32>, vector<8x128xf32> -> vector<8x128xf32>
    %cst_4 = arith.constant dense<0.000000e+00> : vector<128xf32>
    %4 = vector.multi_reduction <add>, %3, %cst_4 [0] : vector<8x128xf32> to vector<128xf32>
    %5 = vector.shape_cast %4 : vector<128xf32> to vector<1x128xf32>
    %cst_5 = arith.constant 8.000000e+00 : f32
    %6 = vector.broadcast %cst_5 : f32 to vector<1x128xf32>
    %7 = arith.divf %5, %6 : vector<1x128xf32>
    %8 = vector.broadcast %7 : vector<1x128xf32> to vector<8x128xf32>
    %9 = arith.subf %3, %8 : vector<8x128xf32>
    %10 = arith.mulf %9, %9 : vector<8x128xf32>
    %cst_6 = arith.constant dense<0.000000e+00> : vector<128xf32>
    %11 = vector.multi_reduction <add>, %10, %cst_6 [0] : vector<8x128xf32> to vector<128xf32>
    %12 = vector.shape_cast %11 : vector<128xf32> to vector<1x128xf32>
    %cst_7 = arith.constant 8.000000e+00 : f32
    %13 = vector.broadcast %cst_7 : f32 to vector<1x128xf32>
    %14 = arith.divf %12, %13 : vector<1x128xf32>
    %c0_8 = arith.constant 0 : index
    %c0_9 = arith.constant 0 : index
    %c0_10 = arith.constant 0 : index
    %15 = vector.load %arg3[%c0_8, %c0_9, %c0_10] : memref<2x2x128xf32, #tpu.memory_space<vmem>>, vector<1x2x128xf32>
    %16 = vector.shape_cast %15 : vector<1x2x128xf32> to vector<2x128xf32>
    %17 = vector.extract_strided_slice %16 {offsets = [0, 0], sizes = [1, 128], strides = [1, 1]} : vector<2x128xf32> to vector<1x128xf32>
    %cst_11 = arith.constant 9.99999974E-6 : f32
    %18 = vector.broadcast %cst_11 : f32 to vector<1x128xf32>
    %19 = arith.addf %14, %18 : vector<1x128xf32>
    %20 = math.rsqrt %19 : vector<1x128xf32>
    %21 = arith.mulf %17, %20 : vector<1x128xf32>
    %22 = vector.extract_strided_slice %16 {offsets = [1, 0], sizes = [1, 128], strides = [1, 1]} : vector<2x128xf32> to vector<1x128xf32>
    %23 = vector.broadcast %21 : vector<1x128xf32> to vector<8x128xf32>
    %24 = arith.mulf %9, %23 : vector<8x128xf32>
    %25 = vector.broadcast %22 : vector<1x128xf32> to vector<8x128xf32>
    %26 = arith.addf %24, %25 : vector<8x128xf32>
    %c1 = arith.constant 1 : index
    %c0_12 = arith.constant 0 : index
    %c0_13 = arith.constant 0 : index
    %27 = vector.load %arg2[%c1, %c0_12, %c0_13] : memref<2x128x128xf32, #tpu.memory_space<vmem>>, vector<1x128x128xf32>
    %28 = vector.shape_cast %27 : vector<1x128x128xf32> to vector<128x128xf32>
    %cst_14 = arith.constant dense<0.000000e+00> : vector<8x128xf32>
    %29 = tpu.matmul %26, %28, %cst_14 {dimension_numbers = #tpu.dot_dimension_numbers<[1], [0], [0], [1], [0, 0, 1, 1], [], []>} : vector<8x128xf32>, vector<128x128xf32>, vector<8x128xf32> -> vector<8x128xf32>
    %cst_15 = arith.constant dense<0.000000e+00> : vector<128xf32>
    %30 = vector.multi_reduction <add>, %29, %cst_15 [0] : vector<8x128xf32> to vector<128xf32>
    %31 = vector.shape_cast %30 : vector<128xf32> to vector<1x128xf32>
    %cst_16 = arith.constant 8.000000e+00 : f32
    %32 = vector.broadcast %cst_16 : f32 to vector<1x128xf32>
    %33 = arith.divf %31, %32 : vector<1x128xf32>
    %34 = vector.broadcast %33 : vector<1x128xf32> to vector<8x128xf32>
    %35 = arith.subf %29, %34 : vector<8x128xf32>
    %36 = arith.mulf %35, %35 : vector<8x128xf32>
    %cst_17 = arith.constant dense<0.000000e+00> : vector<128xf32>
    %37 = vector.multi_reduction <add>, %36, %cst_17 [0] : vector<8x128xf32> to vector<128xf32>
    %38 = vector.shape_cast %37 : vector<128xf32> to vector<1x128xf32>
    %cst_18 = arith.constant 8.000000e+00 : f32
    %39 = vector.broadcast %cst_18 : f32 to vector<1x128xf32>
    %40 = arith.divf %38, %39 : vector<1x128xf32>
    %c1_19 = arith.constant 1 : index
    %c0_20 = arith.constant 0 : index
    %c0_21 = arith.constant 0 : index
    %41 = vector.load %arg3[%c1_19, %c0_20, %c0_21] : memref<2x2x128xf32, #tpu.memory_space<vmem>>, vector<1x2x128xf32>
    %42 = vector.shape_cast %41 : vector<1x2x128xf32> to vector<2x128xf32>
    %43 = vector.extract_strided_slice %42 {offsets = [0, 0], sizes = [1, 128], strides = [1, 1]} : vector<2x128xf32> to vector<1x128xf32>
    %cst_22 = arith.constant 9.99999974E-6 : f32
    %44 = vector.broadcast %cst_22 : f32 to vector<1x128xf32>
    %45 = arith.addf %40, %44 : vector<1x128xf32>
    %46 = math.rsqrt %45 : vector<1x128xf32>
    %47 = arith.mulf %43, %46 : vector<1x128xf32>
    %48 = vector.extract_strided_slice %42 {offsets = [1, 0], sizes = [1, 128], strides = [1, 1]} : vector<2x128xf32> to vector<1x128xf32>
    %49 = vector.broadcast %47 : vector<1x128xf32> to vector<8x128xf32>
    %50 = arith.mulf %35, %49 : vector<8x128xf32>
    %51 = vector.broadcast %48 : vector<1x128xf32> to vector<8x128xf32>
    %52 = arith.addf %50, %51 : vector<8x128xf32>
    %c0_23 = arith.constant 0 : index
    %c0_24 = arith.constant 0 : index
    %53 = vector.load %arg4[%c0_23, %c0_24] : memref<128x128xf32, #tpu.memory_space<vmem>>, vector<128x128xf32>
    %cst_25 = arith.constant dense<0.000000e+00> : vector<8x128xf32>
    %54 = tpu.matmul %52, %53, %cst_25 {dimension_numbers = #tpu.dot_dimension_numbers<[1], [0], [0], [1], [0, 0, 1, 1], [], []>} : vector<8x128xf32>, vector<128x128xf32>, vector<8x128xf32> -> vector<8x128xf32>
    %c0_26 = arith.constant 0 : index
    %c0_27 = arith.constant 0 : index
    %55 = vector.load %arg5[%c0_26, %c0_27] : memref<1x128xf32, #tpu.memory_space<vmem>>, vector<1x128xf32>
    %56 = vector.broadcast %55 : vector<1x128xf32> to vector<8x128xf32>
    %57 = arith.addf %54, %56 : vector<8x128xf32>
    %c0_28 = arith.constant 0 : index
    %c0_29 = arith.constant 0 : index
    %58 = vector.load %arg7[%c0_28, %c0_29] : memref<8x128xf32, #tpu.memory_space<vmem>>, vector<8x128xf32>
    tpu.vector_store %arg7[%c0_28, %c0_29], %57 {strides = array<i32>} : memref<8x128xf32, #tpu.memory_space<vmem>>, vector<8x128xf32>,
    %59 = tpu.iota {dimensions = array<i32: 1>} : vector<8x128xi32>
    %c8_i32 = arith.constant 8 : i32
    %60 = vector.broadcast %c8_i32 : i32 to vector<8x128xi32>
    %61 = arith.cmpi slt, %59, %60 : vector<8x128xi32>
    %cst_30 = arith.constant -1.000000e+30 : f32
    %62 = vector.broadcast %cst_30 : f32 to vector<8x128xf32>
    %63 = arith.select %61, %57, %62 : vector<8x128xi1>, vector<8x128xf32>
    %cst_31 = arith.constant dense<0xFF800000> : vector<8xf32>
    %64 = vector.multi_reduction <maximumf>, %63, %cst_31 [1] : vector<8x128xf32> to vector<8xf32>
    %65 = vector.shape_cast %64 : vector<8xf32> to vector<8x1xf32>
    %66 = vector.broadcast %65 : vector<8x1xf32> to vector<8x128xf32>
    %67 = arith.subf %63, %66 : vector<8x128xf32>
    %68 = math.exp %67 : vector<8x128xf32>
    %cst_32 = arith.constant dense<0.000000e+00> : vector<8xf32>
    %69 = vector.multi_reduction <add>, %68, %cst_32 [1] : vector<8x128xf32> to vector<8xf32>
    %70 = vector.shape_cast %69 : vector<8xf32> to vector<8x1xf32>
    %71 = math.log %70 : vector<8x1xf32>
    %72 = vector.broadcast %71 : vector<8x1xf32> to vector<8x128xf32>
    %73 = arith.subf %67, %72 : vector<8x128xf32>
    %c0_33 = arith.constant 0 : index
    %c0_34 = arith.constant 0 : index
    %74 = vector.load %arg6[%c0_33, %c0_34] : memref<8x128xf32, #tpu.memory_space<vmem>>, vector<8x128xf32>
    tpu.vector_store %arg6[%c0_33, %c0_34], %73 {strides = array<i32>} : memref<8x128xf32, #tpu.memory_space<vmem>>, vector<8x128xf32>,
    return
  }
  func.func @transform_0(%arg0: i32) -> (i32, i32) {
    %c0_i32 = arith.constant 0 : i32
    %c0_i32_0 = arith.constant 0 : i32
    %c0_i32_1 = arith.constant 0 : i32
    return %c0_i32, %c0_i32_0 : i32, i32
  }
  func.func @transform_1(%arg0: i32) -> (i32, i32, i32) {
    %c0_i32 = arith.constant 0 : i32
    %c0_i32_0 = arith.constant 0 : i32
    %c0_i32_1 = arith.constant 0 : i32
    %c0_i32_2 = arith.constant 0 : i32
    return %c0_i32, %c0_i32_0, %c0_i32_1 : i32, i32, i32
  }
  func.func @transform_2(%arg0: i32) -> (i32, i32, i32) {
    %c0_i32 = arith.constant 0 : i32
    %c0_i32_0 = arith.constant 0 : i32
    %c0_i32_1 = arith.constant 0 : i32
    %c0_i32_2 = arith.constant 0 : i32
    return %c0_i32, %c0_i32_0, %c0_i32_1 : i32, i32, i32
  }
  func.func @transform_3(%arg0: i32) -> (i32, i32) {
    %c0_i32 = arith.constant 0 : i32
    %c0_i32_0 = arith.constant 0 : i32
    %c0_i32_1 = arith.constant 0 : i32
    return %c0_i32, %c0_i32_0 : i32, i32
  }
  func.func @transform_4(%arg0: i32) -> (i32, i32) {
    %c0_i32 = arith.constant 0 : i32
    %c0_i32_0 = arith.constant 0 : i32
    %c0_i32_1 = arith.constant 0 : i32
    return %c0_i32, %c0_i32_0 : i32, i32
  }
  func.func @transform_5(%arg0: i32) -> (i32, i32) {
    %c0_i32 = arith.constant 0 : i32
    %c0_i32_0 = arith.constant 0 : i32
    %c0_i32_1 = arith.constant 0 : i32
    return %c0_i32, %c0_i32_0 : i32, i32
  }
  func.func @transform_6(%arg0: i32) -> (i32, i32) {
    %c0_i32 = arith.constant 0 : i32
    %c0_i32_0 = arith.constant 0 : i32
    %c0_i32_1 = arith.constant 0 : i32
    return %c0_i32, %c0_i32_0 : i32, i32
  }
}

</mosaic_0001>

<bundles_post_ra>
// kernel: tpu_custom_call.1
= control target key start
LH: loop header
LB: loop body
LE: loop exit
PB: predicated region body
PF: predicated region fallthrough
CT: control target
= control target key end

     0   :  { %12 = vsyncpa [#allocation3], 0  ;;  %s965_s0 = inlined_call_operand.hbm [shape: f32[8,128], index: 0, kind: input, shape index: {}]   ;;  %s966_s1 = inlined_call_operand.hbm [shape: f32[2,128,128], index: 1, kind: input, shape index: {}]   ;;  %s967_s2 = inlined_call_operand.vmem [shape: f32[2,2,128], index: 2, kind: input, shape index: {}]   ;;  %s968_s3 = inlined_call_operand.hbm [shape: f32[128,128], index: 3, kind: input, shape index: {}]   ;;  %s969_s4 = inlined_call_operand.vmem [shape: f32[1,128], index: 4, kind: input, shape index: {}]   ;;  %s970_s5 = inlined_call_operand.hbm [shape: f32[8,128], index: 5, kind: output, shape index: {0}]   ;;  %s971_s6 = inlined_call_operand.hbm [shape: f32[8,128], index: 6, kind: output, shape index: {1}]  }
   0x1   :  { %13 = vsyncpa [#allocation6], 0 }
   0x2   :  { %14 = vsyncpa [#allocation4], 0 }
   0x3   :  { %15 = vsyncpa [#allocation10], 0  ;;  %s804_s21 = smov [#allocation5]   ;;  %s686_s25 = scalar_lea.hbm %s966_s1, 4096 }
   0x4   :  { %s31_s22 = sshll.u32 %s804_s21, 4  ;;  %p687_p0 = scmp.ne.s32.totalorder %s966_s1, %s686_s25  ;;  %s32_s22 = int_to_ptr.vmem [resolvable:$true] %s31_s22 }
   0x5   :  { %p690_p1 = scmp.lt.u32.totalorder %s686_s25, %s966_s1 }
   0x7   :  { %p692_p2 = pnand %p690_p1, %p687_p0 }
   0x9   :  { %695 = shalt.err (!%p692_p2)
}
   0xa   :  { %s696_s30 = scalar_lea.vmem %s32_s22, 4096  ;;  %p701_p4 = scmp.lt.s32.totalorder %s32_s22, %s32_s22 }
   0xb   :  { %p697_p3 = scmp.ne.s32.totalorder %s32_s22, %s696_s30  ;;  %p702_p5 = scmp.lt.s32.totalorder %s696_s30, %s696_s30 }
   0xd   :  { %p703_p6 = por %p702_p5, %p701_p4 }
   0xf   :  { %p704_p7 = pnand %p703_p6, %p697_p3 }
  0x11   :  { %707 = shalt.err (!%p704_p7)
}
  0x12   :  { %s805_s7 = smov 128   ;;  %s806_s8 = smov 8  }
  0x13   :  { %37 = dma.hbm_to_vmem [thread:$0]  %s966_s1, 4096, %s32_s22, [#allocation6], %s805_s7, %s805_s7, %s806_s8  }
  0x14   :  { %s807_s11 = smov [#allocation2]   ;;  %s808_s13 = smov [#allocation7]  }
  0x15   :  { %s22_s12 = sshll.u32 %s807_s11, 4  ;;  %s45_s14 = sshll.u32 %s808_s13, 4  ;;  %s23_s12 = int_to_ptr.vmem [resolvable:$true] %s22_s12  ;;  %s46_s14 = int_to_ptr.vmem [resolvable:$true] %s45_s14 }
  0x16   :  { %s708_s17 = scalar_lea.hbm %s965_s0, 128 }
  0x17   :  { %p709_p8 = scmp.ne.s32.totalorder %s965_s0, %s708_s17  ;;  %p712_p9 = scmp.lt.u32.totalorder %s708_s17, %s965_s0 }
  0x19   :  { %p714_p10 = pnand %p712_p9, %p709_p8 }
  0x1b   :  { %717 = shalt.err (!%p714_p10)
}
  0x1c   :  { %s718_s1 = scalar_lea.vmem %s23_s12, 128  ;;  %p723_p12 = scmp.lt.s32.totalorder %s23_s12, %s23_s12 }
  0x1d   :  { %p719_p11 = scmp.ne.s32.totalorder %s23_s12, %s718_s1  ;;  %p724_p13 = scmp.lt.s32.totalorder %s718_s1, %s718_s1 }
  0x1f   :  { %p725_p0 = por %p724_p13, %p723_p12 }
  0x21   :  { %p726_p1 = pnand %p725_p0, %p719_p11 }
  0x23   :  { %729 = shalt.err (!%p726_p1)
}
  0x24   :  { %25 = dma.hbm_to_vmem [thread:$0]  %s965_s0, 128, %s23_s12, [#allocation3]  }
  0x25   :  { %s730_s26 = scalar_lea.hbm %s968_s3, 2048 }
  0x26   :  { %p731_p2 = scmp.ne.s32.totalorder %s968_s3, %s730_s26  ;;  %p734_p3 = scmp.lt.u32.totalorder %s730_s26, %s968_s3 }
  0x28   :  { %p736_p4 = pnand %p734_p3, %p731_p2 }
  0x2a   :  { %739 = shalt.err (!%p736_p4)
}
  0x2b   :  { %s740_s9 = scalar_lea.vmem %s46_s14, 2048  ;;  %p745_p6 = scmp.lt.s32.totalorder %s46_s14, %s46_s14 }
  0x2c   :  { %p741_p5 = scmp.ne.s32.totalorder %s46_s14, %s740_s9  ;;  %p746_p7 = scmp.lt.s32.totalorder %s740_s9, %s740_s9 }
  0x2e   :  { %p747_p8 = por %p746_p7, %p745_p6 }
  0x30   :  { %p748_p9 = pnand %p747_p8, %p741_p5 }
  0x32   :  { %751 = shalt.err (!%p748_p9)
}
  0x33   :  { %51 = dma.hbm_to_vmem [thread:$0]  %s968_s3, 2048, %s46_s14, [#allocation6], %s805_s7, %s805_s7, %s806_s8  }
  0x34   :  { %796 = dma.done.wait [#allocation3], 128  }
  0x35   :  { %797 = vsyncadd [#allocation3], 4294967168 }
  0x36   :  { %798 = dma.done.wait [#allocation6], 6144  }
  0x37   :  { %799 = vsyncadd [#allocation6], 4294961152  ;;  %v809_v0 = vmov 0.0|0.0   ;;  %vm810_vm0 = vmmov 0   ;;  %v811_v1 = vmov 0.0   ;;  %v64_v2 = vld [vmem:[#allocation5] sm:$0xff] }
  0x38   :  { %596 = vmatprep.subr.bf16.mxu0 %v809_v0  ;;  %523 = vmatprep.mubr.msk.f32.mxu0 %vm810_vm0, %v811_v1  ;;  %v65_v3 = vld [vmem:[#allocation5 + $0x8] sm:$0xff]  ;;  %v66_v4 = vld [vmem:[#allocation5 + $0x10] sm:$0xff]  ;;  %v67_v6 = vld [vmem:[#allocation5 + $0x18] sm:$0xff] }
  0x39   :  { %620 = vmatprep.subr.bf16.mxu1 %v809_v0  ;;  %558 = vmatprep.mubr.msk.f32.mxu1 %vm810_vm0, %v811_v1  ;;  %v597_v5 = vpack.c.bf16 %v65_v3, %v64_v2  ;;  %v600_v7 = vpack.c.bf16 %v67_v6, %v66_v4  ;;  %v68_v8 = vld [vmem:[#allocation5 + $0x20] sm:$0xff]  ;;  %v69_v9 = vld [vmem:[#allocation5 + $0x28] sm:$0xff]  ;;  %v70_v11 = vld [vmem:[#allocation5 + $0x30] sm:$0xff] }
  0x3a   :  { %v603_v10 = vpack.c.bf16 %v69_v9, %v68_v8  ;;  %v71_v12 = vld [vmem:[#allocation5 + $0x38] sm:$0xff]  ;;  %v72_v14 = vld [vmem:[#allocation5 + $0x40] sm:$0xff]  ;;  %v73_v15 = vld [vmem:[#allocation5 + $0x48] sm:$0xff] }
  0x3b   :  { %598 = vmatpush3.bf16.msra.mxu0 %v597_v5  ;;  %v606_v13 = vpack.c.bf16 %v71_v12, %v70_v11  ;;  %v609_v16 = vpack.c.bf16 %v73_v15, %v72_v14  ;;  %v74_v17 = vld [vmem:[#allocation5 + $0x50] sm:$0xff]  ;;  %v75_v18 = vld [vmem:[#allocation5 + $0x58] sm:$0xff]  ;;  %v76_v20 = vld [vmem:[#allocation5 + $0x60] sm:$0xff] }
  0x3c   :  { %599 = vmatprep.subr.bf16.mxu0 %v809_v0  ;;  %v612_v19 = vpack.c.bf16 %v75_v18, %v74_v17  ;;  %v77_v21 = vld [vmem:[#allocation5 + $0x68] sm:$0xff]  ;;  %v78_v23 = vld [vmem:[#allocation5 + $0x70] sm:$0xff]  ;;  %v79_v24 = vld [vmem:[#allocation5 + $0x78] sm:$0xff] }
  0x3d   :  { %v615_v22 = vpack.c.bf16 %v77_v21, %v76_v20  ;;  %v618_v25 = vpack.c.bf16 %v79_v24, %v78_v23  ;;  %v63_v26 = vld [vmem:[#allocation2] sm:$0xff]  ;;  %v182_v27 = vld [vmem:[#allocation5 + $0x80] sm:$0xff]  ;;  %v183_v28 = vld [vmem:[#allocation5 + $0x88] sm:$0xff] }
  0x3e   :  { %v621_v29 = vpack.c.bf16 %v183_v28, %v182_v27  ;;  %v184_v30 = vld [vmem:[#allocation5 + $0x90] sm:$0xff]  ;;  %v185_v31 = vld [vmem:[#allocation5 + $0x98] sm:$0xff]  ;;  %v186_v33 = vld [vmem:[#allocation5 + $0xa0] sm:$0xff] }
  0x3f   :  { %601 = vmatpush3.bf16.msra.mxu0 %v600_v7  ;;  %v624_v32 = vpack.c.bf16 %v185_v31, %v184_v30  ;;  %v187_v34 = vld [vmem:[#allocation5 + $0xa8] sm:$0xff]  ;;  %v188_v36 = vld [vmem:[#allocation5 + $0xb0] sm:$0xff]  ;;  %v189_v37 = vld [vmem:[#allocation5 + $0xb8] sm:$0xff]  ;;  %v171_v7 = vlaneseq }
  0x40   :  { %602 = vmatprep.subr.bf16.mxu0 %v809_v0  ;;  %622 = vmatpush3.bf16.msra.mxu1 %v621_v29  ;;  %v627_v35 = vpack.c.bf16 %v187_v34, %v186_v33  ;;  %v630_v38 = vpack.c.bf16 %v189_v37, %v188_v36  ;;  %v190_v39 = vld [vmem:[#allocation5 + $0xc0] sm:$0xff]  ;;  %v191_v40 = vld [vmem:[#allocation5 + $0xc8] sm:$0xff]  ;;  %v192_v42 = vld [vmem:[#allocation5 + $0xd0] sm:$0xff] }
  0x41   :  { %623 = vmatprep.subr.bf16.mxu1 %v809_v0  ;;  %v633_v41 = vpack.c.bf16 %v191_v40, %v190_v39  ;;  %v193_v43 = vld [vmem:[#allocation5 + $0xd8] sm:$0xff]  ;;  %v194_v45 = vld [vmem:[#allocation5 + $0xe0] sm:$0xff]  ;;  %v195_v46 = vld [vmem:[#allocation5 + $0xe8] sm:$0xff]  ;;  %v912_v8 = vshrl.u32 %v171_v7, 7 }
  0x42   :  { %v636_v44 = vpack.c.bf16 %v193_v43, %v192_v42  ;;  %v639_v47 = vpack.c.bf16 %v195_v46, %v194_v45  ;;  %v196_v48 = vld [vmem:[#allocation5 + $0xf0] sm:$0xff]  ;;  %v197_v49 = vld [vmem:[#allocation5 + $0xf8] sm:$0xff]  ;;  %v299_v18 = vld [vmem:[#allocation7] sm:$0xff] }
  0x43   :  { %604 = vmatpush3.bf16.msra.mxu0 %v603_v10  ;;  %v642_v50 = vpack.c.bf16 %v197_v49, %v196_v48  ;;  %v167_v9 = vld [vmem:[%s967_s2] sm:$0x3]  ;;  %v173_v10 = vsub.s32 0, %v912_v8  ;;  %v178_v11 = vsub.s32 1, %v912_v8  ;;  %v301_v21 = vld [vmem:[#allocation7 + $0x10] sm:$0xff]  ;;  %v303_v24 = vld [vmem:[#allocation7 + $0x20] sm:$0xff] }
  0x44   :  { %605 = vmatprep.subr.bf16.mxu0 %v809_v0  ;;  %625 = vmatpush3.bf16.msra.mxu1 %v624_v32  ;;  %v305_v27 = vld [vmem:[#allocation7 + $0x30] sm:$0xff]  ;;  %v306_v28 = vld [vmem:[#allocation7 + $0x38] sm:$0xff]  ;;  %v307_v30 = vld [vmem:[#allocation7 + $0x40] sm:$0xff] }
  0x45   :  { %626 = vmatprep.subr.bf16.mxu1 %v809_v0  ;;  %v179_v15 = vrot.slane %v167_v9, %v178_v11  ;;  %v654_v29 = vpack.c.bf16 %v306_v28, %v305_v27  ;;  %v308_v31 = vld [vmem:[#allocation7 + $0x48] sm:$0xff]  ;;  %v309_v33 = vld [vmem:[#allocation7 + $0x50] sm:$0xff]  ;;  %v310_v34 = vld [vmem:[#allocation7 + $0x58] sm:$0xff] }
  0x46   :  { %v657_v32 = vpack.c.bf16 %v308_v31, %v307_v30  ;;  %v311_v36 = vld [vmem:[#allocation7 + $0x60] sm:$0xff]  ;;  %v312_v37 = vld [vmem:[#allocation7 + $0x68] sm:$0xff]  ;;  %v313_v39 = vld [vmem:[#allocation7 + $0x70] sm:$0xff] }
  0x47   :  { %607 = vmatpush3.bf16.msra.mxu0 %v606_v13  ;;  %v314_v40 = vld [vmem:[#allocation7 + $0x78] sm:$0xff] }
  0x48   :  { %608 = vmatprep.subr.bf16.mxu0 %v809_v0  ;;  %628 = vmatpush3.bf16.msra.mxu1 %v627_v35  ;;  %v660_v35 = vpack.c.bf16 %v310_v34, %v309_v33 }
  0x49   :  { %629 = vmatprep.subr.bf16.mxu1 %v809_v0 }
  0x4b   :  { %610 = vmatpush3.bf16.msra.mxu0 %v609_v16 }
  0x4c   :  { %611 = vmatprep.subr.bf16.mxu0 %v809_v0  ;;  %631 = vmatpush3.bf16.msra.mxu1 %v630_v38  ;;  %v663_v38 = vpack.c.bf16 %v312_v37, %v311_v36 }
  0x4d   :  { %632 = vmatprep.subr.bf16.mxu1 %v809_v0 }
  0x4f   :  { %613 = vmatpush3.bf16.msra.mxu0 %v612_v19  ;;  %v300_v19 = vld [vmem:[#allocation7 + $0x8] sm:$0xff] }
  0x50   :  { %614 = vmatprep.subr.bf16.mxu0 %v809_v0  ;;  %634 = vmatpush3.bf16.msra.mxu1 %v633_v41  ;;  %v645_v20 = vpack.c.bf16 %v300_v19, %v299_v18  ;;  %v666_v41 = vpack.c.bf16 %v314_v40, %v313_v39 }
  0x51   :  { %635 = vmatprep.subr.bf16.mxu1 %v809_v0 }
  0x53   :  { %616 = vmatpush3.bf16.msra.mxu0 %v615_v22  ;;  %v302_v22 = vld [vmem:[#allocation7 + $0x18] sm:$0xff] }
  0x54   :  { %617 = vmatprep.subr.bf16.mxu0 %v809_v0  ;;  %637 = vmatpush3.bf16.msra.mxu1 %v636_v44  ;;  %v648_v23 = vpack.c.bf16 %v302_v22, %v301_v21 }
  0x55   :  { %638 = vmatprep.subr.bf16.mxu1 %v809_v0 }
  0x57   :  { %619 = vmatpush3.bf16.msra.mxu0 %v618_v25  ;;  %v304_v25 = vld [vmem:[#allocation7 + $0x28] sm:$0xff] }
  0x58   :  { %644 = vmatprep.subr.bf16.mxu0 %v809_v0  ;;  %640 = vmatpush3.bf16.msra.mxu1 %v639_v47 }
  0x59   :  { %641 = vmatprep.subr.bf16.mxu1 %v809_v0 }
  0x5a   :  { %524 = vmatmul.mubr.f32.vlgmr.msra.gmra.mrb[0].mxu0 %v63_v26  ;;  %v651_v26 = vpack.c.bf16 %v304_v25, %v303_v24 }
  0x5b   :  { %593 = vmatprep.mubr.msk.f32.mxu0 %vm810_vm0, %v811_v1  ;;  %646 = vmatpush3.bf16.msra.mxu0 %v645_v20 }
  0x5c   :  { %643 = vmatpush3.bf16.msra.mxu1 %v642_v50  ;;  %647 = vmatprep.subr.bf16.mxu0 %v809_v0 }
  0x5f   :  { %649 = vmatpush3.bf16.msra.mxu0 %v648_v23 }
  0x60   :  { %650 = vmatprep.subr.bf16.mxu0 %v809_v0 }
  0x63   :  { %652 = vmatpush3.bf16.msra.mxu0 %v651_v26 }
  0x64   :  { %653 = vmatprep.subr.bf16.mxu0 %v809_v0 }
  0x67   :  { %655 = vmatpush3.bf16.msra.mxu0 %v654_v29 }
  0x68   :  { %656 = vmatprep.subr.bf16.mxu0 %v809_v0 }
  0x6b   :  { %658 = vmatpush3.bf16.msra.mxu0 %v657_v32 }
  0x6c   :  { %659 = vmatprep.subr.bf16.mxu0 %v809_v0 }
  0x6f   :  { %661 = vmatpush3.bf16.msra.mxu0 %v660_v35 }
  0x70   :  { %662 = vmatprep.subr.bf16.mxu0 %v809_v0 }
  0x73   :  { %664 = vmatpush3.bf16.msra.mxu0 %v663_v38 }
  0x74   :  { %665 = vmatprep.subr.bf16.mxu0 %v809_v0 }
  0x77   :  { %667 = vmatpush3.bf16.msra.mxu0 %v666_v41 }
 0x12d   :  { %v146_v51 = vpop.f32.mrb[0].mxu0 }
 0x12e   :  { %v150_v52 = vrot.slane %v146_v51, 4  ;;  %v525_v53 = vpop.f32.mrb[1].mxu0 }
 0x130   :  { %v151_v54 = vadd.f32 %v150_v52, %v146_v51 }
 0x132   :  { %v152_v55 = vrot.slane %v151_v54, 2 }
 0x134   :  { %v153_v56 = vadd.f32 %v152_v55, %v151_v54 }
 0x136   :  { %v154_v57 = vrot.slane %v153_v56, 1 }
 0x138   :  { %v155_v58 = vadd.f32 %v154_v57, %v153_v56 }
 0x13a   :  { %v157_v59 = vmul.f32 0.125, %v155_v58 }
 0x13c   :  { %v158_v60 = vsub.f32 %v146_v51, %v157_v59 }
 0x13e   :  { %v159_v61 = vmul.f32 %v158_v60, %v158_v60 }
 0x140   :  { %v160_v62 = vrot.slane %v159_v61, 4 }
 0x142   :  { %v161_v63 = vadd.f32 %v160_v62, %v159_v61 }
 0x144   :  { %v162_v1 = vrot.slane %v161_v63, 2 }
 0x146   :  { %v163_v2 = vadd.f32 %v162_v1, %v161_v63 }
 0x148   :  { %v164_v3 = vrot.slane %v163_v2, 1 }
 0x14a   :  { %v165_v4 = vadd.f32 %v164_v3, %v163_v2 }
 0x14c   :  { %v166_v5 = vmul.f32 0.125, %v165_v4  ;;  %v394_v4 = vand.u32 127, %v171_v7 }
 0x14e   :  { %v168_v6 = vadd.f32 1e-05, %v166_v5  ;;  %v439_v5 = vld [vmem:[%s969_s4] ss:$0 sm:$0xff]  ;;  %vm395_vm1 = vcmp.lt.s32.totalorder %v394_v4, 8 }
 0x150   :  { %678 = vrsqrt.f32 %v168_v6 }
 0x15a   :  { %v679_v12 = vpop.eup %678 }
 0x15b   :  { %v170_v13 = vmul.f32 %v679_v12, %v167_v9 }
 0x15d   :  { %v174_v14 = vrot.slane %v170_v13, %v173_v10 }
 0x15f   :  { %v175_v16 = vmul.f32 %v174_v14, %v158_v60  ;;  %v438_v60 = vld [vmem:[%s967_s2 + $0x2] sm:$0x3]  ;;  %s812_s2 = smov [#allocation9]  }
 0x160   :  { %v297_v1 = vrot.slane %v438_v60, %v178_v11  ;;  %s424_s14 = sshll.u32 %s812_s2, 4  ;;  %s425_s14 = int_to_ptr.vmem [resolvable:$true] %s424_s14 }
 0x161   :  { %v180_v17 = vadd.f32 %v179_v15, %v175_v16  ;;  %s752_s15 = scalar_lea.vmem %s425_s14, 128  ;;  %p757_p11 = scmp.lt.s32.totalorder %s425_s14, %s425_s14 }
 0x162   :  { %p753_p10 = scmp.ne.s32.totalorder %s425_s14, %s752_s15  ;;  %p758_p12 = scmp.lt.s32.totalorder %s752_s15, %s752_s15 }
 0x163   :  { %559 = vmatmul.mubr.f32.vlgmr.msra.gmra.mrb[0].mxu1 %v180_v17 }
 0x164   :  { %p759_p13 = por %p758_p12, %p757_p11 }
 0x166   :  { %p760_p0 = pnand %p759_p13, %p753_p10 }
 0x236   :  { %v264_v42 = vpop.f32.mrb[0].mxu1 }
 0x237   :  { %v268_v43 = vrot.slane %v264_v42, 4  ;;  %v560_v44 = vpop.f32.mrb[1].mxu1 }
 0x239   :  { %v269_v45 = vadd.f32 %v268_v43, %v264_v42 }
 0x23b   :  { %v270_v46 = vrot.slane %v269_v45, 2 }
 0x23d   :  { %v271_v47 = vadd.f32 %v270_v46, %v269_v45 }
 0x23f   :  { %v272_v48 = vrot.slane %v271_v47, 1 }
 0x241   :  { %v273_v49 = vadd.f32 %v272_v48, %v271_v47 }
 0x243   :  { %v274_v50 = vmul.f32 0.125, %v273_v49 }
 0x245   :  { %v275_v51 = vsub.f32 %v264_v42, %v274_v50 }
 0x247   :  { %v276_v52 = vmul.f32 %v275_v51, %v275_v51 }
 0x249   :  { %v277_v53 = vrot.slane %v276_v52, 4 }
 0x24b   :  { %v278_v54 = vadd.f32 %v277_v53, %v276_v52 }
 0x24d   :  { %v279_v55 = vrot.slane %v278_v54, 2 }
 0x24f   :  { %v280_v56 = vadd.f32 %v279_v55, %v278_v54 }
 0x251   :  { %v281_v0 = vrot.slane %v280_v56, 1 }
 0x253   :  { %v282_v57 = vadd.f32 %v281_v0, %v280_v56 }
 0x255   :  { %v283_v58 = vmul.f32 0.125, %v282_v57 }
 0x257   :  { %v286_v59 = vadd.f32 1e-05, %v283_v58 }
 0x259   :  { %680 = vrsqrt.f32 %v286_v59 }
 0x263   :  { %v681_v61 = vpop.eup %680 }
 0x264   :  { %v288_v62 = vmul.f32 %v681_v61, %v438_v60 }
 0x266   :  { %v292_v63 = vrot.slane %v288_v62, %v173_v10 }
 0x268   :  { %v293_v2 = vmul.f32 %v292_v63, %v275_v51 }
 0x26a   :  { %v298_v3 = vadd.f32 %v297_v1, %v293_v2 }
 0x26c   :  { %594 = vmatmul.mubr.f32.vlgmr.msra.gmra.mrb[2].mxu0 %v298_v3 }
 0x33f   :  { %v388_v6 = vpop.f32.mrb[2].mxu0 }
 0x340   :  { %v389_v9 = vadd.f32 %v439_v5, %v388_v6  ;;  %v595_v12 = vpop.f32.mrb[3].mxu0 }
 0x342   :  { %392 = vst [vmem:[#allocation9] sm:$0xff] %v389_v9  ;;  %v396_v13 = vsel %vm395_vm1, %v389_v9, -1e+30 }
 0x343   :  { %397 = vmax.xlane.f32.xlu0 %v396_v13 }
 0x3d0   :  { %v398_v10 = vpop.xlane.xlu0 %397 }
 0x3d1   :  { %v399_v14 = vsub.f32 %v396_v13, %v398_v10 }
 0x3d3   :  { %v400_v8 = vmul.f32 1.442695, %v399_v14 }
 0x3d5   :  { %682 = vpow2.f32 %v400_v8 }
 0x3df   :  { %v683_v11 = vpop.eup %682 }
 0x3e0   :  { %402 = vadd.xlane.f32.xlu0 %v683_v11 }
 0x3e1   :  { %763 = shalt.err (!%p760_p0)
}
 0x3e2   :  { %s764_s17 = scalar_lea.hbm %s971_s6, 128 }
 0x3e3   :  { %p765_p1 = scmp.ne.s32.totalorder %s971_s6, %s764_s17  ;;  %p768_p2 = scmp.lt.u32.totalorder %s764_s17, %s971_s6 }
 0x3e5   :  { %p770_p3 = pnand %p768_p2, %p765_p1 }
 0x3e7   :  { %773 = shalt.err (!%p770_p3)
}
 0x3e8   :  { %427 = dma.vmem_to_hbm [thread:$0]  %s425_s14, 128, %s971_s6, [#allocation10]  }
 0x3e9   :  { %s813_s23 = smov [#allocation8]  }
 0x3ea   :  { %s414_s24 = sshll.u32 %s813_s23, 4  ;;  %s415_s24 = int_to_ptr.vmem [resolvable:$true] %s414_s24 }
 0x3eb   :  { %s774_s25 = scalar_lea.vmem %s415_s24, 128  ;;  %p779_p5 = scmp.lt.s32.totalorder %s415_s24, %s415_s24 }
 0x3ec   :  { %p775_p4 = scmp.ne.s32.totalorder %s415_s24, %s774_s25  ;;  %p780_p6 = scmp.lt.s32.totalorder %s774_s25, %s774_s25 }
 0x3ee   :  { %p781_p7 = por %p780_p6, %p779_p5 }
 0x3f0   :  { %p782_p8 = pnand %p781_p7, %p775_p4 }
 0x46d   :  { %v403_v7 = vpop.xlane.xlu0 %402 }
 0x46e   :  { %684 = vlog2.f32 %v403_v7 }
 0x478   :  { %v685_v15 = vpop.eup %684 }
 0x479   :  { %v405_v16 = vmul.f32 0.6931472, %v685_v15 }
 0x47b   :  { %v406_v17 = vsub.f32 %v399_v14, %v405_v16 }
 0x47d   :  { %407 = vst [vmem:[#allocation8] sm:$0xff] %v406_v17 }
 0x47e   :  { %785 = shalt.err (!%p782_p8)
}
 0x47f   :  { %s786_s6 = scalar_lea.hbm %s970_s5, 128 }
 0x480   :  { %p787_p9 = scmp.ne.s32.totalorder %s970_s5, %s786_s6  ;;  %p790_p10 = scmp.lt.u32.totalorder %s786_s6, %s970_s5 }
 0x482   :  { %p792_p11 = pnand %p790_p10, %p787_p9 }
 0x484   :  { %795 = shalt.err (!%p792_p11)
}
 0x485   :  { %417 = dma.vmem_to_hbm [thread:$0]  %s415_s24, 128, %s970_s5, [#allocation4]  }
 0x486   :  { %800 = dma.done.wait [#allocation4], 128  }
 0x487   :  { %801 = vsyncadd [#allocation4], 4294967168 }
 0x488   :  { %802 = dma.done.wait [#allocation10], 128  }
 0x489   :  { %803 = vsyncadd [#allocation10], 4294967168 }
 0x48a   :  { %434 = vsyncpa [#allocation3], 1 }
 0x48b   :  { %435 = vsyncpa [#allocation6], 1 }
 0x48c   :  { %436 = vsyncpa [#allocation4], 1 }
 0x48d   :  { %437 = vsyncpa [#allocation10], 1 }

</bundles_post_ra>
